<compile_context>
chip_gen: v7x
topology: tpu7x:2x2x1
jax: 0.10.0
libtpu: 0.0.40
codegen_flags: <defaults>
</compile_context>

<pallas_src>
import functools

import jax
import jax.numpy as jnp
from jax.experimental import pallas as pl
from jax.experimental.pallas import tpu as pltpu


# -----------------------------------------------------------------------------
# Kernel: one block of crop rows -> bf16 matmul -> f32 softmax -> reduce matmul
# -----------------------------------------------------------------------------
def _ensemble_kernel(feats_ref, w_ref, b_ref, r_ref, out_ref):
    i = pl.program_id(0)

    @pl.when(i == 0)
    def _():
        out_ref[...] = jnp.zeros_like(out_ref)

    # Batched classifier over all crop rows in this block: (tm, D) @ (D, K).
    # Inputs are bf16, accumulation in f32 on the MXU.
    logits = jnp.dot(feats_ref[...], w_ref[...],
                     preferred_element_type=jnp.float32)
    logits = logits + b_ref[...]  # (tm, K) + (1, K)

    # Row-wise softmax, numerically stable, all math in f32.
    m = jnp.max(logits, axis=-1, keepdims=True)
    e = jnp.exp(logits - m)
    s = jnp.sum(e, axis=-1, keepdims=True)
    p = e * pl.reciprocal(s, approx=True)  # EUP reciprocal, not a VALU divide

    # Crop-ensemble reduction as one tiny matmul: (N, tm) @ (tm, K).
    # r already carries the 1/n_crops averaging; zero-padded rows have zero
    # weight, so no extra masking or final scaling is needed.
    out_ref[...] += jnp.dot(r_ref[...], p, preferred_element_type=jnp.float32)


def multi_crop_ensemble(x, w, b, cropsize, flipping=True, block_rows=512):
    """x: [N, C, H, W] f32; w: [C*cs*cs, K]; b: [K]. Returns [N, K] f32."""
    N, C, H, W = x.shape
    cs = cropsize
    assert H >= cs and W >= cs
    D, K = w.shape
    assert D == C * cs * cs

    x1, x2, cx = 0, H - cs, H // 2 - cs // 2
    y1, y2, cy = 0, W - cs, W // 2 - cs // 2

    def crops_of(img):
        return [
            img[:, :, x1:x1 + cs, y1:y1 + cs],
            img[:, :, x1:x1 + cs, y2:y2 + cs],
            img[:, :, x2:x2 + cs, y1:y1 + cs],
            img[:, :, x2:x2 + cs, y2:y2 + cs],
            img[:, :, cx:cx + cs, cy:cy + cs],
        ]

    crop_list = crops_of(x)
    if flipping:
        crop_list = crop_list + crops_of(jnp.flip(x, axis=3))  # arr[:, :, :, ::-1]
    n_crops = len(crop_list)

    # Stack all crops on the row axis -> one batched matmul in the kernel.
    # (XLA fuses the slice/flip/reshape/concat into the feats materialization.)
    feats = jnp.concatenate([c.reshape(N, D) for c in crop_list], axis=0)
    feats = feats.astype(jnp.bfloat16)           # MXU operands in bf16
    w_bf = w.astype(jnp.bfloat16)
    b2 = b.reshape(1, K).astype(jnp.float32)

    # Reduction matrix: out[n, k] = sum_c (1/n_crops) * p[c*N + n, k].
    r = jnp.tile(jnp.eye(N, dtype=jnp.float32), (1, n_crops)) * (1.0 / n_crops)

    # Row blocking: single full-extent block for small problems, otherwise
    # (8,128)-aligned 512-row blocks with zero padding (masked by zero columns
    # of r, so padded rows contribute nothing).
    M_total = n_crops * N
    tm = M_total if M_total <= block_rows else block_rows
    M_pad = ((M_total + tm - 1) // tm) * tm
    num_blocks = M_pad // tm
    if M_pad != M_total:
        feats = jnp.pad(feats, ((0, M_pad - M_total), (0, 0)))
        r = jnp.pad(r, ((0, 0), (0, M_pad - M_total)))

    # NOTE: W/b/r have constant block indices so they stay resident; at large
    # D*K one would tile K (two-pass softmax) and raise vmem_limit_bytes.
    out = pl.pallas_call(
        _ensemble_kernel,
        out_shape=jax.ShapeDtypeStruct((N, K), jnp.float32),
        grid_spec=pltpu.PrefetchScalarGridSpec(
            num_scalar_prefetch=0,
            grid=(num_blocks,),
            in_specs=[
                pl.BlockSpec((tm, D), lambda i: (i, 0)),   # crop-row block
                pl.BlockSpec((D, K), lambda i: (0, 0)),    # weights (resident)
                pl.BlockSpec((1, K), lambda i: (0, 0)),    # bias (resident)
                pl.BlockSpec((N, tm), lambda i: (0, i)),   # reduce-matrix block
            ],
            out_specs=pl.BlockSpec((N, K), lambda i: (0, 0)),  # resident accum
        ),
        compiler_params=pltpu.CompilerParams(
            dimension_semantics=("arbitrary",),  # output accumulates over blocks
        ),
    )(feats, w_bf, b2, r)
    return out


# -----------------------------------------------------------------------------
# Pure-JAX f32 reference (matches the PyTorch module's forward semantics)
# -----------------------------------------------------------------------------
def _reference(x, w, b, cropsize, flipping=True):
    N, C, H, W = x.shape
    cs = cropsize
    x1, x2, cx = 0, H - cs, H // 2 - cs // 2
    y1, y2, cy = 0, W - cs, W // 2 - cs // 2

    def go(img):
        feats = img.reshape(N, -1)
        return jax.nn.softmax(feats @ w + b, axis=-1)

    def crops_of(img):
        return [
            img[:, :, x1:x1 + cs, y1:y1 + cs],
            img[:, :, x1:x1 + cs, y2:y2 + cs],
            img[:, :, x2:x2 + cs, y1:y1 + cs],
            img[:, :, x2:x2 + cs, y2:y2 + cs],
            img[:, :, cx:cx + cs, cy:cy + cs],
        ]

    crop_list = crops_of(x)
    if flipping:
        crop_list += crops_of(jnp.flip(x, axis=3))
    y = sum(go(c) for c in crop_list)
    return y / float(len(crop_list))


if __name__ == "__main__":
    key = jax.random.PRNGKey(0)
    k_x, k_w, k_b = jax.random.split(key, 3)

    # Small shapes consistent with the module's forward
    N, C, H, W = 2, 4, 16, 16
    cropsize = 8
    num_classes = 128
    D = C * cropsize * cropsize  # 256

    x = jax.random.normal(k_x, (N, C, H, W), dtype=jnp.float32)
    w = jax.random.normal(k_w, (D, num_classes), dtype=jnp.float32) * 0.05
    b = jax.random.normal(k_b, (num_classes,), dtype=jnp.float32) * 0.01

    run = functools.partial(multi_crop_ensemble, cropsize=cropsize, flipping=True)
    y = run(x, w, b)
    y = jax.block_until_ready(y)

    y_ref = _reference(x, w, b, cropsize, flipping=True)
    assert y.shape == (N, num_classes)
    # Tolerances account for bf16 MXU inputs + approx EUP reciprocal.
    assert jnp.allclose(y, y_ref, atol=3e-3, rtol=3e-2), "mismatch vs reference"
    # Averaged probabilities still sum to ~1 per row.
    assert jnp.allclose(jnp.sum(y, axis=-1), 1.0, atol=5e-3)

    print("KERNEL_OK")
</pallas_src>

<mosaic_0001>
module attributes {stable_mosaic.version = 11 : i64} {
  func.func @_ensemble_kernel(%arg0: i32, %arg1: memref<20x256xbf16, #tpu.memory_space<vmem>>, %arg2: memref<256x128xbf16, #tpu.memory_space<vmem>>, %arg3: memref<1x128xf32, #tpu.memory_space<vmem>>, %arg4: memref<2x20xf32, #tpu.memory_space<vmem>>, %arg5: memref<2x128xf32, #tpu.memory_space<vmem>>) attributes {dimension_semantics = [#tpu.dimension_semantics<arbitrary>], iteration_bounds = array<i64: 1>, scalar_prefetch = 0 : i64, scratch_operands = 0 : i64, tpu.core_type = #tpu.core_type<tc>, window_params = [{transform_indices = @transform_0, window_bounds = array<i64: 20, 256>}, {pipeline_mode = #tpu.pipeline_mode<synchronous>, transform_indices = @transform_1, window_bounds = array<i64: 256, 128>}, {pipeline_mode = #tpu.pipeline_mode<synchronous>, transform_indices = @transform_2, window_bounds = array<i64: 1, 128>}, {transform_indices = @transform_3, window_bounds = array<i64: 2, 20>}, {pipeline_mode = #tpu.pipeline_mode<synchronous>, transform_indices = @transform_4, window_bounds = array<i64: 2, 128>}]} {
    %c0_i32 = arith.constant 0 : i32
    %0 = arith.cmpi eq, %arg0, %c0_i32 : i32
    %1 = arith.extui %0 : i1 to i32
    %c0_i32_0 = arith.constant 0 : i32
    %2 = arith.cmpi ne, %1, %c0_i32_0 : i32
    scf.if %2 {
      %cst_15 = arith.constant 0.000000e+00 : f32
      %24 = vector.broadcast %cst_15 : f32 to vector<2x128xf32>
      %c0_16 = arith.constant 0 : index
      %c0_17 = arith.constant 0 : index
      %25 = vector.load %arg5[%c0_16, %c0_17] : memref<2x128xf32, #tpu.memory_space<vmem>>, vector<2x128xf32>
      tpu.vector_store %arg5[%c0_16, %c0_17], %24 {strides = array<i32>} : memref<2x128xf32, #tpu.memory_space<vmem>>, vector<2x128xf32>,
    } else {
    }
    %c0 = arith.constant 0 : index
    %c0_1 = arith.constant 0 : index
    %3 = vector.load %arg1[%c0, %c0_1] : memref<20x256xbf16, #tpu.memory_space<vmem>>, vector<20x256xbf16>
    %c0_2 = arith.constant 0 : index
    %c0_3 = arith.constant 0 : index
    %4 = vector.load %arg2[%c0_2, %c0_3] : memref<256x128xbf16, #tpu.memory_space<vmem>>, vector<256x128xbf16>
    %cst = arith.constant dense<0.000000e+00> : vector<20x128xf32>
    %5 = tpu.matmul %3, %4, %cst {dimension_numbers = #tpu.dot_dimension_numbers<[1], [0], [0], [1], [0, 0, 1, 1], [], []>} : vector<20x256xbf16>, vector<256x128xbf16>, vector<20x128xf32> -> vector<20x128xf32>
    %c0_4 = arith.constant 0 : index
    %c0_5 = arith.constant 0 : index
    %6 = vector.load %arg3[%c0_4, %c0_5] : memref<1x128xf32, #tpu.memory_space<vmem>>, vector<1x128xf32>
    %7 = vector.broadcast %6 : vector<1x128xf32> to vector<20x128xf32>
    %8 = arith.addf %5, %7 : vector<20x128xf32>
    %cst_6 = arith.constant dense<0xFF800000> : vector<20xf32>
    %9 = vector.multi_reduction <maximumf>, %8, %cst_6 [1] : vector<20x128xf32> to vector<20xf32>
    %10 = vector.shape_cast %9 : vector<20xf32> to vector<20x1xf32>
    %11 = vector.broadcast %10 : vector<20x1xf32> to vector<20x128xf32>
    %12 = arith.subf %8, %11 : vector<20x128xf32>
    %13 = math.exp %12 : vector<20x128xf32>
    %cst_7 = arith.constant dense<0.000000e+00> : vector<20xf32>
    %14 = vector.multi_reduction <add>, %13, %cst_7 [1] : vector<20x128xf32> to vector<20xf32>
    %15 = vector.shape_cast %14 : vector<20xf32> to vector<20x1xf32>
    %16 = tpu.reciprocal %15 {approx = true} : vector<20x1xf32> -> vector<20x1xf32>
    %17 = vector.broadcast %16 : vector<20x1xf32> to vector<20x128xf32>
    %18 = arith.mulf %13, %17 : vector<20x128xf32>
    %c0_8 = arith.constant 0 : index
    %c0_9 = arith.constant 0 : index
    %19 = vector.load %arg5[%c0_8, %c0_9] : memref<2x128xf32, #tpu.memory_space<vmem>>, vector<2x128xf32>
    %c0_10 = arith.constant 0 : index
    %c0_11 = arith.constant 0 : index
    %20 = vector.load %arg4[%c0_10, %c0_11] : memref<2x20xf32, #tpu.memory_space<vmem>>, vector<2x20xf32>
    %cst_12 = arith.constant dense<0.000000e+00> : vector<2x128xf32>
    %21 = tpu.matmul %20, %18, %cst_12 {dimension_numbers = #tpu.dot_dimension_numbers<[1], [0], [0], [1], [0, 0, 1, 1], [], []>} : vector<2x20xf32>, vector<20x128xf32>, vector<2x128xf32> -> vector<2x128xf32>
    %22 = arith.addf %19, %21 : vector<2x128xf32>
    %c0_13 = arith.constant 0 : index
    %c0_14 = arith.constant 0 : index
    %23 = vector.load %arg5[%c0_13, %c0_14] : memref<2x128xf32, #tpu.memory_space<vmem>>, vector<2x128xf32>
    tpu.vector_store %arg5[%c0_13, %c0_14], %22 {strides = array<i32>} : memref<2x128xf32, #tpu.memory_space<vmem>>, vector<2x128xf32>,
    return
  }
  func.func @transform_0(%arg0: i32) -> (i32, i32) {
    %c0_i32 = arith.constant 0 : i32
    %c0_i32_0 = arith.constant 0 : i32
    return %arg0, %c0_i32 : i32, i32
  }
  func.func @transform_1(%arg0: i32) -> (i32, i32) {
    %c0_i32 = arith.constant 0 : i32
    %c0_i32_0 = arith.constant 0 : i32
    %c0_i32_1 = arith.constant 0 : i32
    return %c0_i32, %c0_i32_0 : i32, i32
  }
  func.func @transform_2(%arg0: i32) -> (i32, i32) {
    %c0_i32 = arith.constant 0 : i32
    %c0_i32_0 = arith.constant 0 : i32
    %c0_i32_1 = arith.constant 0 : i32
    return %c0_i32, %c0_i32_0 : i32, i32
  }
  func.func @transform_3(%arg0: i32) -> (i32, i32) {
    %c0_i32 = arith.constant 0 : i32
    %c0_i32_0 = arith.constant 0 : i32
    return %c0_i32, %arg0 : i32, i32
  }
  func.func @transform_4(%arg0: i32) -> (i32, i32) {
    %c0_i32 = arith.constant 0 : i32
    %c0_i32_0 = arith.constant 0 : i32
    %c0_i32_1 = arith.constant 0 : i32
    return %c0_i32, %c0_i32_0 : i32, i32
  }
}

</mosaic_0001>

<bundles_post_ra>
// kernel: tpu_custom_call.1
= control target key start
LH: loop header
LB: loop body
LE: loop exit
PB: predicated region body
PF: predicated region fallthrough
CT: control target
= control target key end

     0   :  { %9 = vsyncpa [#allocation3], 0  ;;  %s660_s0 = inlined_call_operand.hbm [shape: bf16[20,256], index: 0, kind: input, shape index: {}]   ;;  %s661_s1 = inlined_call_operand.hbm [shape: bf16[256,128], index: 1, kind: input, shape index: {}]   ;;  %s662_s2 = inlined_call_operand.vmem [shape: f32[1,128], index: 2, kind: input, shape index: {}]   ;;  %s663_s3 = inlined_call_operand.vmem [shape: f32[2,20], index: 3, kind: input, shape index: {}]   ;;  %s664_s4 = inlined_call_operand.hbm [shape: f32[2,128], index: 4, kind: output, shape index: {}]  }
   0x1   :  { %10 = vsyncpa [#allocation6], 0 }
   0x2   :  { %11 = vsyncpa [#allocation4], 0  ;;  %s580_s15 = smov [#allocation2]   ;;  %s508_s19 = scalar_lea.hbm %s660_s0, 384 }
   0x3   :  { %s17_s16 = sshll.u32 %s580_s15, 4  ;;  %p509_p0 = scmp.ne.s32.totalorder %s660_s0, %s508_s19  ;;  %s18_s16 = int_to_ptr.vmem [resolvable:$true] %s17_s16 }
   0x4   :  { %p512_p1 = scmp.lt.u32.totalorder %s508_s19, %s660_s0 }
   0x6   :  { %p514_p2 = pnand %p512_p1, %p509_p0 }
   0x8   :  { %517 = shalt.err (!%p514_p2)
}
   0x9   :  { %s518_s24 = scalar_lea.vmem %s18_s16, 384  ;;  %p523_p4 = scmp.lt.s32.totalorder %s18_s16, %s18_s16 }
   0xa   :  { %p519_p3 = scmp.ne.s32.totalorder %s18_s16, %s518_s24  ;;  %p524_p5 = scmp.lt.s32.totalorder %s518_s24, %s518_s24 }
   0xc   :  { %p525_p6 = por %p524_p5, %p523_p4 }
   0xe   :  { %p526_p7 = pnand %p525_p6, %p519_p3 }
  0x10   :  { %529 = shalt.err (!%p526_p7)
}
  0x11   :  { %s581_s25 = smov 128   ;;  %s582_s26 = smov 8  }
  0x12   :  { %23 = dma.hbm_to_vmem [thread:$0]  %s660_s0, 384, %s18_s16, [#allocation3], %s581_s25, %s581_s25, %s582_s26  }
  0x13   :  { %s583_s29 = smov [#allocation5]   ;;  %s530_s7 = scalar_lea.hbm %s661_s1, 2048 }
  0x14   :  { %s29_s30 = sshll.u32 %s583_s29, 4  ;;  %p531_p8 = scmp.ne.s32.totalorder %s661_s1, %s530_s7  ;;  %s30_s30 = int_to_ptr.vmem [resolvable:$true] %s29_s30 }
  0x15   :  { %p534_p9 = scmp.lt.u32.totalorder %s530_s7, %s661_s1 }
  0x17   :  { %p536_p10 = pnand %p534_p9, %p531_p8 }
  0x19   :  { %539 = shalt.err (!%p536_p10)
}
  0x1a   :  { %s540_s12 = scalar_lea.vmem %s30_s30, 2048  ;;  %p545_p12 = scmp.lt.s32.totalorder %s30_s30, %s30_s30 }
  0x1b   :  { %p541_p11 = scmp.ne.s32.totalorder %s30_s30, %s540_s12  ;;  %p546_p13 = scmp.lt.s32.totalorder %s540_s12, %s540_s12 }
  0x1d   :  { %p547_p0 = por %p546_p13, %p545_p12 }
  0x1f   :  { %p548_p1 = pnand %p547_p0, %p541_p11 }
  0x21   :  { %551 = shalt.err (!%p548_p1)
}
  0x22   :  { %s584_s0 = smov 64   ;;  %s585_s13 = smov 4  }
  0x23   :  { %35 = dma.hbm_to_vmem [thread:$0]  %s661_s1, 2048, %s30_s30, [#allocation6], %s584_s0, %s584_s0, %s585_s13  }
  0x24   :  { %574 = dma.done.wait [#allocation3], 384  }
  0x25   :  { %575 = vsyncadd [#allocation3], 4294966912 }
  0x26   :  { %576 = dma.done.wait [#allocation6], 2048  }
  0x27   :  { %577 = vsyncadd [#allocation6], 4294965248  ;;  %v475_v0 = vld [vmem:[#allocation5 + $0x40] sm:$0xff]   ;;  %v477_v2 = vld [vmem:[#allocation5 + $0x48] sm:$0xff]   ;;  %vm259_vm0 = vcmask 1043456   ;;  %v586_v50 = vmov 0.0|0.0  }
  0x28   :  { %v476_v1 = vld [vmem:[#allocation5] sm:$0xff]   ;;  %405 = vmatprep.subr.bf16.mxu0 %v475_v0  ;;  %449 = vmatprep.subr.bf16.mxu1 %v475_v0  ;;  %v478_v3 = vld [vmem:[#allocation5 + $0x8] sm:$0xff]   ;;  %v479_v4 = vld [vmem:[#allocation5 + $0x50] sm:$0xff]   ;;  %v587_v51 = vmov 0.0   ;;  %vm588_vm1 = vmmov 0   ;;  %vm287_vm2 = vcmask 162816  }
  0x29   :  { %406 = vmatpush3.bf16.msra.mxu0 %v476_v1  ;;  %457 = vmatpush3.bf16.msra.mxu1 %v476_v1  ;;  %v480_v5 = vld [vmem:[#allocation5 + $0x10] sm:$0xff]   ;;  %v481_v6 = vld [vmem:[#allocation5 + $0x58] sm:$0xff]   ;;  %v483_v8 = vld [vmem:[#allocation5 + $0x60] sm:$0xff]   ;;  %51 = vst [vmem:[#allocation7] sm:$0x3] %v587_v51  ;;  %s589_s18 = smov [#allocation7]  }
  0x2a   :  { %407 = vmatprep.subr.bf16.mxu0 %v477_v2  ;;  %450 = vmatprep.subr.bf16.mxu1 %v477_v2  ;;  %v482_v7 = vld [vmem:[#allocation5 + $0x18] sm:$0xff]   ;;  %v484_v9 = vld [vmem:[#allocation5 + $0x20] sm:$0xff]   ;;  %v485_v10 = vld [vmem:[#allocation5 + $0x68] sm:$0xff]   ;;  %s372_s19 = sshll.u32 %s589_s18, 4  ;;  %s373_s19 = int_to_ptr.vmem [resolvable:$true] %s372_s19 }
  0x2b   :  { %v493_v11 = vld [vmem:[#allocation2 + $0x4] ss:$8 sps:$4 sm:$0xff]   ;;  %v54_v12 = vld [vmem:[#allocation2 + $0x10] sm:$0x33]  ;;  %v491_v19 = vld [vmem:[#allocation2] ss:$8 sps:$4 sm:$0xff]   ;;  %p557_p3 = scmp.lt.s32.totalorder %s373_s19, %s373_s19 }
  0x2c   :  { %v386_v13 = vcombine.high %v54_v12, %v54_v12  ;;  %v486_v14 = vld [vmem:[#allocation5 + $0x28] sm:$0xff]   ;;  %v487_v15 = vld [vmem:[#allocation5 + $0x70] sm:$0xff]   ;;  %239 = vmatprep.mubr.bf16.mxu0 %v493_v11  ;;  %v489_v17 = vld [vmem:[#allocation5 + $0x78] sm:$0xff]   ;;  %v385_v20 = vcombine.low %v54_v12, %v54_v12  ;;  %s552_s20 = scalar_lea.vmem %s373_s19, 32 }
  0x2d   :  { %408 = vmatpush3.bf16.msra.mxu0 %v478_v3  ;;  %458 = vmatpush3.bf16.msra.mxu1 %v478_v3  ;;  %v488_v16 = vld [vmem:[#allocation5 + $0x30] sm:$0xff]   ;;  %v490_v18 = vld [vmem:[#allocation5 + $0x38] sm:$0xff]   ;;  %v382_v25 = vld [vmem:[%s662_s2] ss:$0 sm:$0xff]  ;;  %p553_p2 = scmp.ne.s32.totalorder %s373_s19, %s552_s20  ;;  %p558_p4 = scmp.lt.s32.totalorder %s552_s20, %s552_s20 }
  0x2e   :  { %409 = vmatprep.subr.bf16.mxu0 %v479_v4  ;;  %451 = vmatprep.subr.bf16.mxu1 %v479_v4  ;;  %v286_v62 = vld [vmem:[%s663_s3] sm:$0x3] }
  0x2f   :  { %247 = vmatprep.mubr.bf16.mxu1 %v386_v13  ;;  %p559_p5 = por %p558_p4, %p557_p3 }
  0x30   :  { %v285_v63 = vld [vmem:[#allocation7] sm:$0x3] }
  0x31   :  { %410 = vmatpush3.bf16.msra.mxu0 %v480_v5  ;;  %459 = vmatpush3.bf16.msra.mxu1 %v480_v5  ;;  %p560_p6 = pnand %p559_p5, %p553_p2 }
  0x32   :  { %411 = vmatprep.subr.bf16.mxu0 %v481_v6  ;;  %452 = vmatprep.subr.bf16.mxu1 %v481_v6 }
  0x35   :  { %412 = vmatpush3.bf16.msra.mxu0 %v482_v7  ;;  %460 = vmatpush3.bf16.msra.mxu1 %v482_v7 }
  0x36   :  { %413 = vmatprep.subr.bf16.mxu0 %v483_v8  ;;  %453 = vmatprep.subr.bf16.mxu1 %v483_v8 }
  0x39   :  { %414 = vmatpush3.bf16.msra.mxu0 %v484_v9  ;;  %461 = vmatpush3.bf16.msra.mxu1 %v484_v9 }
  0x3a   :  { %415 = vmatprep.subr.bf16.mxu0 %v485_v10  ;;  %454 = vmatprep.subr.bf16.mxu1 %v485_v10 }
  0x3d   :  { %416 = vmatpush3.bf16.msra.mxu0 %v486_v14  ;;  %462 = vmatpush3.bf16.msra.mxu1 %v486_v14 }
  0x3e   :  { %417 = vmatprep.subr.bf16.mxu0 %v487_v15  ;;  %455 = vmatprep.subr.bf16.mxu1 %v487_v15 }
  0x41   :  { %418 = vmatpush3.bf16.msra.mxu0 %v488_v16  ;;  %463 = vmatpush3.bf16.msra.mxu1 %v488_v16 }
  0x42   :  { %419 = vmatprep.subr.bf16.mxu0 %v489_v17  ;;  %456 = vmatprep.subr.bf16.mxu1 %v489_v17 }
  0x45   :  { %420 = vmatpush3.bf16.msra.mxu0 %v490_v18  ;;  %464 = vmatpush3.bf16.msra.mxu1 %v490_v18 }
  0x46   :  { %446 = vmatprep.subr.bf16.mxu1 %v586_v50 }
  0x48   :  { %240 = vmatmul.mubr.bf16.vlgmr.msra.gmra.mrb[0].mxu0 %v491_v19  ;;  %248 = vmatmul.mubr.bf16.vlgmr.msra.gmra.mrb[0].mxu1 %v385_v20 }
  0x49   :  { %443 = vmatprep.mubr.msk.f32.mxu1 %vm588_vm1, %v587_v51 }
 0x11b   :  { %v421_v21 = vpop.f32.mrb[0].mxu0  ;;  %v427_v22 = vpop.f32.mrb[0].mxu1 }
 0x11c   :  { %v422_v23 = vpop.f32.mrb[1].mxu0  ;;  %v428_v24 = vpop.f32.mrb[1].mxu1 }
 0x11d   :  { %v423_v26 = vadd.f32 %v422_v23, %v421_v21  ;;  %v429_v27 = vadd.f32 %v428_v24, %v427_v22  ;;  %v424_v28 = vpop.f32.mrb[2].mxu0  ;;  %v430_v29 = vpop.f32.mrb[2].mxu1 }
 0x11e   :  { %v425_v30 = vpop.f32.mrb[3].mxu0  ;;  %v431_v31 = vpop.f32.mrb[3].mxu1 }
 0x11f   :  { %v426_v32 = vadd.f32 %v425_v30, %v424_v28  ;;  %v242_v33 = vadd.f32 %v423_v26, %v382_v25  ;;  %v250_v34 = vadd.f32 %v429_v27, %v382_v25 }
 0x121   :  { %255 = vmax.xlane.f32.xlu0 %v242_v33  ;;  %v260_v35 = vsel %vm259_vm0, %v250_v34, -inf  ;;  %v245_v36 = vadd.f32 %v426_v32, %v382_v25 }
 0x122   :  { %261 = vmax.xlane.f32.xlu1 %v260_v35 }
 0x125   :  { %257 = vmax.xlane.f32.xlu0 %v245_v36 }
 0x1ae   :  { %v256_v37 = vpop.xlane.xlu0 %255 }
 0x1af   :  { %v263_v38 = vsub.f32 %v242_v33, %v256_v37  ;;  %v262_v39 = vpop.xlane.xlu1 %261 }
 0x1b0   :  { %v265_v40 = vsub.f32 %v250_v34, %v262_v39 }
 0x1b1   :  { %v266_v41 = vmul.f32 1.442695, %v263_v38 }
 0x1b2   :  { %v270_v42 = vmul.f32 1.442695, %v265_v40  ;;  %v258_v43 = vpop.xlane.xlu0 %257 }
 0x1b3   :  { %496 = vpow2.f32 %v266_v41  ;;  %v264_v44 = vsub.f32 %v245_v36, %v258_v43 }
 0x1b4   :  { %498 = vpow2.f32 %v270_v42 }
 0x1b5   :  { %v268_v45 = vmul.f32 1.442695, %v264_v44 }
 0x1b7   :  { %500 = vpow2.f32 %v268_v45 }
 0x1bd   :  { %v497_v46 = vpop.eup %496 }
 0x1be   :  { %v499_v47 = vpop.eup %498  ;;  %272 = vadd.xlane.f32.xlu1 %v497_v46 }
 0x1bf   :  { %v276_v49 = vsel %vm259_vm0, %v499_v47, 0.0 }
 0x1c1   :  { %v501_v48 = vpop.eup %500 }
 0x1c2   :  { %277 = vadd.xlane.f32.xlu1 %v276_v49  ;;  %274 = vadd.xlane.f32.xlu0 %v501_v48 }
 0x24b   :  { %v273_v52 = vpop.xlane.xlu1 %272 }
 0x24c   :  { %502 = vrcp.f32 %v273_v52 }
 0x24f   :  { %v275_v53 = vpop.xlane.xlu0 %274  ;;  %v278_v54 = vpop.xlane.xlu1 %277 }
 0x250   :  { %504 = vrcp.f32 %v275_v53 }
 0x251   :  { %506 = vrcp.f32 %v278_v54 }
 0x256   :  { %v503_v55 = vpop.eup %502 }
 0x257   :  { %v282_v57 = vmul.f32 %v503_v55, %v497_v46 }
 0x25a   :  { %v505_v56 = vpop.eup %504 }
 0x25b   :  { %v283_v58 = vmul.f32 %v505_v56, %v501_v48  ;;  %v507_v60 = vpop.eup %506 }
 0x25c   :  { %v284_v61 = vmul.f32 %v507_v60, %v499_v47 }
 0x25d   :  { %v447_v59 = vpack.c.bf16 %v283_v58, %v282_v57 }
 0x25f   :  { %448 = vmatpush3.bf16.msra.mxu1 %v447_v59 }
 0x260   :  { %441 = vmatprep.subr.mxu1 %v587_v51 }
 0x263   :  { %442 = vmatpush3.msk.msra.mxu1 %vm259_vm0, %v284_v61 }
 0x264   :  { %444 = vmatmul.mubr.msk.f32.vlgmr.msra.gmra.mrb[4].mxu1 %vm287_vm2, %v286_v62 }
 0x337   :  { %v360_v0 = vpop.f32.mrb[4].mxu1 }
 0x338   :  { %v364_v1 = vadd.f32 %v360_v0, %v285_v63  ;;  %v445_v2 = vpop.f32.mrb[5].mxu1 }
 0x33a   :  { %365 = vst [vmem:[#allocation7] sm:$0x3] %v364_v1 }
 0x33b   :  { %563 = shalt.err (!%p560_p6)
}
 0x33c   :  { %s564_s22 = scalar_lea.hbm %s664_s4, 32 }
 0x33d   :  { %p565_p7 = scmp.ne.s32.totalorder %s664_s4, %s564_s22  ;;  %p568_p8 = scmp.lt.u32.totalorder %s564_s22, %s664_s4 }
 0x33f   :  { %p570_p9 = pnand %p568_p8, %p565_p7 }
 0x341   :  { %573 = shalt.err (!%p570_p9)
}
 0x342   :  { %375 = dma.vmem_to_hbm [thread:$0]  %s373_s19, 32, %s664_s4, [#allocation4]  }
 0x343   :  { %578 = dma.done.wait [#allocation4], 32  }
 0x344   :  { %579 = vsyncadd [#allocation4], 4294967264 }
 0x345   :  { %379 = vsyncpa [#allocation3], 1 }
 0x346   :  { %380 = vsyncpa [#allocation6], 1 }
 0x347   :  { %381 = vsyncpa [#allocation4], 1 }

</bundles_post_ra>
